<compile_context>
chip_gen: v5e
topology: v5e:2x2
jax: 0.10.0
libtpu: 0.0.40
codegen_flags: <defaults>
</compile_context>

<pallas_src>
import functools

import jax
import jax.numpy as jnp
import numpy as np
from jax import lax
from jax.experimental import pallas as pl
from jax.experimental.pallas import tpu as pltpu

LANES = 128
TARGET_TILE_ROWS = 4096          # (4096,128) f32 block = 2 MiB; 3 in x 2 bufs = 12 MiB
CHUNK_ROWS = 256                 # in-kernel row chunk (bounds live intermediates)
VMEM_LIMIT_BYTES = 32 * 1024 * 1024
EPS = 1e-4


def _sublane_mult(*dtypes):
    """Sublane packing multiple for the widest-packing input dtype
    (f32 -> 8, bf16 -> 16, 1-byte types -> 32)."""
    m = 8
    for dt in dtypes:
        m = max(m, 32 // max(1, jnp.dtype(dt).itemsize))
    return m


def _int_pow_or_pow(x, alpha):
    """x**alpha.  Small integer alpha -> plain VPU multiplies instead of
    jnp.power (which lowers to exp(alpha*log(x)) on the single-slot EUP)."""
    a = float(alpha)
    if a.is_integer() and 0 <= int(a) <= 8:
        n = int(a)
        if n == 0:
            return jnp.ones_like(x)
        y = x
        for _ in range(n - 1):
            y = y * x
        return y
    return jnp.power(x, a)


def _gfl_kernel(pred_ref, pos_ref, neg_ref, out_ref, *,
                alpha, rows_valid, tile_rows, chunk_offsets, need_mask):
    """Per-tile focal-loss partial sums.

    out_ref block: (4, 8, LANES) accumulator, resident across the grid:
        [0] pos_loss partial, [1] neg_loss partial,
        [2] pos_target partial, [3] neg_target partial.
    Only the last grid step pays the row mask (when need_mask is True).
    """
    i = pl.program_id(0)

    @pl.when(i == 0)
    def _init():
        out_ref[...] = jnp.zeros_like(out_ref)

    def _partial(x, cr):
        # (cr, LANES) -> (8, LANES) via tile-aligned reshape + VPU adds;
        # no cross-lane reduction in the hot loop.
        return jnp.sum(x.reshape(cr // 8, 8, LANES), axis=0)

    def _accumulate(apply_mask):
        # Static chunk loop: intermediates stay bounded to (CHUNK_ROWS, LANES).
        for r0, cr in chunk_offsets:
            p = jnp.clip(pred_ref[pl.ds(r0, cr), :].astype(jnp.float32),
                         EPS, 1.0 - EPS)
            pos_t = pos_ref[pl.ds(r0, cr), :].astype(jnp.float32)
            neg_t = neg_ref[pl.ds(r0, cr), :].astype(jnp.float32)

            pos_loss = -jnp.log(p) * _int_pow_or_pow(1.0 - p, alpha) * pos_t
            neg_loss = -jnp.log(1.0 - p) * _int_pow_or_pow(p, alpha) * neg_t

            if apply_mask:
                # Zero contributions from rows past the true row count
                # (ragged last-block overhang; garbage is removed by select).
                row_ids = (lax.broadcasted_iota(jnp.int32, (cr, LANES), 0)
                           + (i * tile_rows + r0))
                m = row_ids < rows_valid
                zero = jnp.zeros_like(pos_loss)
                pos_loss = jnp.where(m, pos_loss, zero)
                neg_loss = jnp.where(m, neg_loss, zero)
                pos_t = jnp.where(m, pos_t, zero)
                neg_t = jnp.where(m, neg_t, zero)

            out_ref[0] += _partial(pos_loss, cr)
            out_ref[1] += _partial(neg_loss, cr)
            out_ref[2] += _partial(pos_t, cr)
            out_ref[3] += _partial(neg_t, cr)

    if not need_mask:
        _accumulate(False)
    else:
        last = pl.num_programs(0) - 1

        @pl.when(i < last)
        def _interior():
            _accumulate(False)       # fast path: no mask on interior tiles

        @pl.when(i == last)
        def _tail():
            _accumulate(True)        # masked path only on the last tile


def _level_sums(pred, pos, neg, alpha):
    """[pos_loss_sum, neg_loss_sum, pos_target_sum, neg_target_sum] for one level."""
    pred_f = jnp.asarray(pred).reshape(-1)
    pos_f = jnp.asarray(pos).reshape(-1)
    neg_f = jnp.asarray(neg).reshape(-1)
    n = pred_f.size
    if n == 0:   # degenerate guard
        return jnp.zeros((4,), jnp.float32)

    sub = _sublane_mult(pred_f.dtype, pos_f.dtype, neg_f.dtype)

    # Lane alignment: only non-128-multiple levels pay one per-level pad pass.
    lane_pad = (-n) % LANES
    rows = (n + lane_pad) // LANES

    # Tiny levels (< one sublane tile of rows): pad rows up to `sub` so the
    # block never exceeds the array (copies at most sub*LANES elements).
    row_pad = sub - rows if rows < sub else 0
    rows += row_pad

    tail = lane_pad + row_pad * LANES
    if tail:
        pred_f = jnp.pad(pred_f, (0, tail))   # pred pad value is loss-neutral
        pos_f = jnp.pad(pos_f, (0, tail))     # (padded targets are 0)
        neg_f = jnp.pad(neg_f, (0, tail))

    pred2 = pred_f.reshape(rows, LANES)
    pos2 = pos_f.reshape(rows, LANES)
    neg2 = neg_f.reshape(rows, LANES)

    if rows >= TARGET_TILE_ROWS:
        tile_rows = TARGET_TILE_ROWS
    else:
        tile_rows = max(sub, (rows // sub) * sub)
    num_blocks = (rows + tile_rows - 1) // tile_rows
    need_mask = (rows % tile_rows) != 0

    # Static in-kernel chunk schedule (all offsets/lengths sublane-aligned).
    chunk_offsets = []
    r0 = 0
    while r0 < tile_rows:
        cr = min(CHUNK_ROWS, tile_rows - r0)
        chunk_offsets.append((r0, cr))
        r0 += cr

    kernel = functools.partial(
        _gfl_kernel, alpha=float(alpha), rows_valid=rows, tile_rows=tile_rows,
        chunk_offsets=tuple(chunk_offsets), need_mask=need_mask)

    elems = rows * LANES
    in_bytes = sum(int(a.size) * a.dtype.itemsize for a in (pred2, pos2, neg2))
    cost = pl.CostEstimate(flops=16 * elems, transcendentals=2 * elems,
                           bytes_accessed=in_bytes + 4 * 8 * LANES * 4)

    partials = pl.pallas_call(
        kernel,
        out_shape=jax.ShapeDtypeStruct((4, 8, LANES), jnp.float32),
        grid_spec=pltpu.PrefetchScalarGridSpec(
            num_scalar_prefetch=0,
            grid=(num_blocks,),
            in_specs=[pl.BlockSpec((tile_rows, LANES), lambda i: (i, 0))] * 3,
            out_specs=pl.BlockSpec((4, 8, LANES), lambda i: (0, 0, 0)),
        ),
        compiler_params=pltpu.CompilerParams(
            dimension_semantics=("arbitrary",),
            vmem_limit_bytes=VMEM_LIMIT_BYTES),
        cost_estimate=cost,
    )(pred2, pos2, neg2)

    # Tiny (4*8*128 floats) final reduction stays in plain JAX.
    return jnp.sum(partials, axis=(1, 2))


class MyGaussianFocalLoss:
    """JAX/Pallas port of mmdet3d MyGaussianFocalLoss (forward only)."""

    def __init__(self, alpha=2.0, gamma=4.0, reduction="mean", loss_weight=1.0):
        self.alpha = alpha
        self.gamma = gamma          # accepted but unused: matches the reference
        self.reduction = reduction
        self.loss_weight = loss_weight

    def __call__(self, preds, center_heatmap_poses, center_heatmap_negs,
                 avg_factor=None, reduction_override=None):
        if not isinstance(preds, (list, tuple)):
            preds = [preds]
            center_heatmap_poses = [center_heatmap_poses]
            center_heatmap_negs = [center_heatmap_negs]

        sums = jnp.zeros((4,), jnp.float32)
        for p, cp, cn in zip(preds, center_heatmap_poses, center_heatmap_negs):
            sums = sums + _level_sums(p, cp, cn, self.alpha)

        pos_losses, neg_losses = sums[0], sums[1]
        pos_nums, neg_nums = sums[2], sums[3]

        loss = pos_losses + neg_losses
        num = jnp.maximum(pos_nums, 1.0)
        if self.reduction == "mean":
            loss = loss / num
        return (self.loss_weight * loss,
                dict(pos=pos_losses / num,
                     neg=neg_losses / jnp.maximum(neg_nums, 1.0)))


def _reference(preds, poses, negs, alpha=2.0, loss_weight=1.0, reduction="mean"):
    """Pure-JAX reference matching the PyTorch semantics (same clamp as spec)."""
    loss = pos_l = neg_l = pos_n = neg_n = 0.0
    for pred, pos, neg in zip(preds, poses, negs):
        p = jnp.clip(pred.astype(jnp.float32), EPS, 1.0 - EPS)
        pl_ = -jnp.log(p) * jnp.power(1.0 - p, alpha) * pos.astype(jnp.float32)
        nl_ = -jnp.log(1.0 - p) * jnp.power(p, alpha) * neg.astype(jnp.float32)
        pos_l += pl_.sum()
        neg_l += nl_.sum()
        loss += pl_.sum() + nl_.sum()
        pos_n += pos.astype(jnp.float32).sum()
        neg_n += neg.astype(jnp.float32).sum()
    num = jnp.maximum(pos_n, 1.0)
    if reduction == "mean":
        loss = loss / num
    return (loss_weight * loss,
            dict(pos=pos_l / num, neg=neg_l / jnp.maximum(neg_n, 1.0)))


if __name__ == "__main__":
    key = jax.random.PRNGKey(0)

    # Three small heatmap levels covering the code paths:
    #   (2,4,16,16): 2048 elems, 128-aligned -> zero-copy fast path
    #   (1,2,10,10):  200 elems -> lane pad + tiny row pad path
    #   (2,3,8,24) : 1152 elems = 9 rows -> ragged last block, masked tail path
    shapes = [(2, 4, 16, 16), (1, 2, 10, 10), (2, 3, 8, 24)]
    preds, poses, negs = [], [], []
    for shape in shapes:
        k1, k2, k3, key = jax.random.split(key, 4)
        preds.append(jax.nn.sigmoid(jax.random.normal(k1, shape, dtype=jnp.float32)))
        poses.append(jax.random.uniform(k2, shape, dtype=jnp.float32))
        negs.append(jax.random.uniform(k3, shape, dtype=jnp.float32))

    module = MyGaussianFocalLoss(alpha=2.0, gamma=4.0, reduction="mean",
                                 loss_weight=1.0)
    loss, parts = module(preds, poses, negs)
    loss = jax.block_until_ready(loss)
    parts = {k: jax.block_until_ready(v) for k, v in parts.items()}

    ref_loss, ref_parts = _reference(preds, poses, negs)
    np.testing.assert_allclose(np.asarray(loss), np.asarray(ref_loss),
                               rtol=1e-4, atol=1e-5)
    np.testing.assert_allclose(np.asarray(parts["pos"]),
                               np.asarray(ref_parts["pos"]),
                               rtol=1e-4, atol=1e-5)
    np.testing.assert_allclose(np.asarray(parts["neg"]),
                               np.asarray(ref_parts["neg"]),
                               rtol=1e-4, atol=1e-5)

    print("KERNEL_OK")
</pallas_src>

<mosaic_0001>
module attributes {stable_mosaic.version = 11 : i64} {
  func.func @_gfl_kernel(%arg0: i32, %arg1: memref<16x128xf32, #tpu.memory_space<vmem>>, %arg2: memref<16x128xf32, #tpu.memory_space<vmem>>, %arg3: memref<16x128xf32, #tpu.memory_space<vmem>>, %arg4: memref<4x8x128xf32, #tpu.memory_space<vmem>>) attributes {dimension_semantics = [#tpu.dimension_semantics<arbitrary>], iteration_bounds = array<i64: 1>, scalar_prefetch = 0 : i64, scratch_operands = 0 : i64, tpu.core_type = #tpu.core_type<tc>, window_params = [{transform_indices = @transform_0, window_bounds = array<i64: 16, 128>}, {transform_indices = @transform_1, window_bounds = array<i64: 16, 128>}, {transform_indices = @transform_2, window_bounds = array<i64: 16, 128>}, {pipeline_mode = #tpu.pipeline_mode<synchronous>, transform_indices = @transform_3, window_bounds = array<i64: 4, 8, 128>}]} {
    %c0_i32 = arith.constant 0 : i32
    %0 = arith.cmpi eq, %arg0, %c0_i32 : i32
    %1 = arith.extui %0 : i1 to i32
    %c0_i32_0 = arith.constant 0 : i32
    %2 = arith.cmpi ne, %1, %c0_i32_0 : i32
    scf.if %2 {
      %cst_36 = arith.constant 0.000000e+00 : f32
      %58 = vector.broadcast %cst_36 : f32 to vector<4x8x128xf32>
      %c0_37 = arith.constant 0 : index
      %c0_38 = arith.constant 0 : index
      %c0_39 = arith.constant 0 : index
      %59 = vector.load %arg4[%c0_37, %c0_38, %c0_39] : memref<4x8x128xf32, #tpu.memory_space<vmem>>, vector<4x8x128xf32>
      tpu.vector_store %arg4[%c0_37, %c0_38, %c0_39], %58 {strides = array<i32>} : memref<4x8x128xf32, #tpu.memory_space<vmem>>, vector<4x8x128xf32>,
    } else {
    }
    %c0 = arith.constant 0 : index
    %c0_1 = arith.constant 0 : index
    %3 = vector.load %arg1[%c0, %c0_1] : memref<16x128xf32, #tpu.memory_space<vmem>>, vector<16x128xf32>
    %cst = arith.constant 9.99999974E-5 : f32
    %cst_2 = arith.constant 0.999899983 : f32
    %4 = vector.broadcast %cst : f32 to vector<16x128xf32>
    %5 = arith.maximumf %4, %3 : vector<16x128xf32>
    %6 = vector.broadcast %cst_2 : f32 to vector<16x128xf32>
    %7 = arith.minimumf %6, %5 : vector<16x128xf32>
    %c0_3 = arith.constant 0 : index
    %c0_4 = arith.constant 0 : index
    %8 = vector.load %arg2[%c0_3, %c0_4] : memref<16x128xf32, #tpu.memory_space<vmem>>, vector<16x128xf32>
    %c0_5 = arith.constant 0 : index
    %c0_6 = arith.constant 0 : index
    %9 = vector.load %arg3[%c0_5, %c0_6] : memref<16x128xf32, #tpu.memory_space<vmem>>, vector<16x128xf32>
    %10 = math.log %7 : vector<16x128xf32>
    %cst_7 = arith.constant 0.000000e+00 : f32
    %11 = vector.broadcast %cst_7 : f32 to vector<16x128xf32>
    %12 = arith.subf %11, %10 : vector<16x128xf32>
    %cst_8 = arith.constant 1.000000e+00 : f32
    %13 = vector.broadcast %cst_8 : f32 to vector<16x128xf32>
    %14 = arith.subf %13, %7 : vector<16x128xf32>
    %15 = arith.mulf %14, %14 : vector<16x128xf32>
    %16 = arith.mulf %12, %15 : vector<16x128xf32>
    %17 = arith.mulf %16, %8 : vector<16x128xf32>
    %cst_9 = arith.constant 1.000000e+00 : f32
    %18 = vector.broadcast %cst_9 : f32 to vector<16x128xf32>
    %19 = arith.subf %18, %7 : vector<16x128xf32>
    %20 = math.log %19 : vector<16x128xf32>
    %cst_10 = arith.constant 0.000000e+00 : f32
    %21 = vector.broadcast %cst_10 : f32 to vector<16x128xf32>
    %22 = arith.subf %21, %20 : vector<16x128xf32>
    %23 = arith.mulf %7, %7 : vector<16x128xf32>
    %24 = arith.mulf %22, %23 : vector<16x128xf32>
    %25 = arith.mulf %24, %9 : vector<16x128xf32>
    %c0_11 = arith.constant 0 : index
    %c0_12 = arith.constant 0 : index
    %c0_13 = arith.constant 0 : index
    %26 = vector.load %arg4[%c0_11, %c0_12, %c0_13] : memref<4x8x128xf32, #tpu.memory_space<vmem>>, vector<1x8x128xf32>
    %27 = vector.shape_cast %26 : vector<1x8x128xf32> to vector<8x128xf32>
    %28 = vector.shape_cast %17 : vector<16x128xf32> to vector<2x8x128xf32>
    %cst_14 = arith.constant dense<0.000000e+00> : vector<8x128xf32>
    %29 = vector.multi_reduction <add>, %28, %cst_14 [0] : vector<2x8x128xf32> to vector<8x128xf32>
    %30 = arith.addf %27, %29 : vector<8x128xf32>
    %c0_15 = arith.constant 0 : index
    %c0_16 = arith.constant 0 : index
    %c0_17 = arith.constant 0 : index
    %31 = vector.load %arg4[%c0_15, %c0_16, %c0_17] : memref<4x8x128xf32, #tpu.memory_space<vmem>>, vector<1x8x128xf32>
    %32 = vector.shape_cast %31 : vector<1x8x128xf32> to vector<8x128xf32>
    %33 = vector.shape_cast %30 : vector<8x128xf32> to vector<1x8x128xf32>
    tpu.vector_store %arg4[%c0_15, %c0_16, %c0_17], %33 {strides = array<i32>} : memref<4x8x128xf32, #tpu.memory_space<vmem>>, vector<1x8x128xf32>,
    %c1 = arith.constant 1 : index
    %c0_18 = arith.constant 0 : index
    %c0_19 = arith.constant 0 : index
    %34 = vector.load %arg4[%c1, %c0_18, %c0_19] : memref<4x8x128xf32, #tpu.memory_space<vmem>>, vector<1x8x128xf32>
    %35 = vector.shape_cast %34 : vector<1x8x128xf32> to vector<8x128xf32>
    %36 = vector.shape_cast %25 : vector<16x128xf32> to vector<2x8x128xf32>
    %cst_20 = arith.constant dense<0.000000e+00> : vector<8x128xf32>
    %37 = vector.multi_reduction <add>, %36, %cst_20 [0] : vector<2x8x128xf32> to vector<8x128xf32>
    %38 = arith.addf %35, %37 : vector<8x128xf32>
    %c1_21 = arith.constant 1 : index
    %c0_22 = arith.constant 0 : index
    %c0_23 = arith.constant 0 : index
    %39 = vector.load %arg4[%c1_21, %c0_22, %c0_23] : memref<4x8x128xf32, #tpu.memory_space<vmem>>, vector<1x8x128xf32>
    %40 = vector.shape_cast %39 : vector<1x8x128xf32> to vector<8x128xf32>
    %41 = vector.shape_cast %38 : vector<8x128xf32> to vector<1x8x128xf32>
    tpu.vector_store %arg4[%c1_21, %c0_22, %c0_23], %41 {strides = array<i32>} : memref<4x8x128xf32, #tpu.memory_space<vmem>>, vector<1x8x128xf32>,
    %c2 = arith.constant 2 : index
    %c0_24 = arith.constant 0 : index
    %c0_25 = arith.constant 0 : index
    %42 = vector.load %arg4[%c2, %c0_24, %c0_25] : memref<4x8x128xf32, #tpu.memory_space<vmem>>, vector<1x8x128xf32>
    %43 = vector.shape_cast %42 : vector<1x8x128xf32> to vector<8x128xf32>
    %44 = vector.shape_cast %8 : vector<16x128xf32> to vector<2x8x128xf32>
    %cst_26 = arith.constant dense<0.000000e+00> : vector<8x128xf32>
    %45 = vector.multi_reduction <add>, %44, %cst_26 [0] : vector<2x8x128xf32> to vector<8x128xf32>
    %46 = arith.addf %43, %45 : vector<8x128xf32>
    %c2_27 = arith.constant 2 : index
    %c0_28 = arith.constant 0 : index
    %c0_29 = arith.constant 0 : index
    %47 = vector.load %arg4[%c2_27, %c0_28, %c0_29] : memref<4x8x128xf32, #tpu.memory_space<vmem>>, vector<1x8x128xf32>
    %48 = vector.shape_cast %47 : vector<1x8x128xf32> to vector<8x128xf32>
    %49 = vector.shape_cast %46 : vector<8x128xf32> to vector<1x8x128xf32>
    tpu.vector_store %arg4[%c2_27, %c0_28, %c0_29], %49 {strides = array<i32>} : memref<4x8x128xf32, #tpu.memory_space<vmem>>, vector<1x8x128xf32>,
    %c3 = arith.constant 3 : index
    %c0_30 = arith.constant 0 : index
    %c0_31 = arith.constant 0 : index
    %50 = vector.load %arg4[%c3, %c0_30, %c0_31] : memref<4x8x128xf32, #tpu.memory_space<vmem>>, vector<1x8x128xf32>
    %51 = vector.shape_cast %50 : vector<1x8x128xf32> to vector<8x128xf32>
    %52 = vector.shape_cast %9 : vector<16x128xf32> to vector<2x8x128xf32>
    %cst_32 = arith.constant dense<0.000000e+00> : vector<8x128xf32>
    %53 = vector.multi_reduction <add>, %52, %cst_32 [0] : vector<2x8x128xf32> to vector<8x128xf32>
    %54 = arith.addf %51, %53 : vector<8x128xf32>
    %c3_33 = arith.constant 3 : index
    %c0_34 = arith.constant 0 : index
    %c0_35 = arith.constant 0 : index
    %55 = vector.load %arg4[%c3_33, %c0_34, %c0_35] : memref<4x8x128xf32, #tpu.memory_space<vmem>>, vector<1x8x128xf32>
    %56 = vector.shape_cast %55 : vector<1x8x128xf32> to vector<8x128xf32>
    %57 = vector.shape_cast %54 : vector<8x128xf32> to vector<1x8x128xf32>
    tpu.vector_store %arg4[%c3_33, %c0_34, %c0_35], %57 {strides = array<i32>} : memref<4x8x128xf32, #tpu.memory_space<vmem>>, vector<1x8x128xf32>,
    return
  }
  func.func @transform_0(%arg0: i32) -> (i32, i32) {
    %c0_i32 = arith.constant 0 : i32
    %c0_i32_0 = arith.constant 0 : i32
    return %arg0, %c0_i32 : i32, i32
  }
  func.func @transform_1(%arg0: i32) -> (i32, i32) {
    %c0_i32 = arith.constant 0 : i32
    %c0_i32_0 = arith.constant 0 : i32
    return %arg0, %c0_i32 : i32, i32
  }
  func.func @transform_2(%arg0: i32) -> (i32, i32) {
    %c0_i32 = arith.constant 0 : i32
    %c0_i32_0 = arith.constant 0 : i32
    return %arg0, %c0_i32 : i32, i32
  }
  func.func @transform_3(%arg0: i32) -> (i32, i32, i32) {
    %c0_i32 = arith.constant 0 : i32
    %c0_i32_0 = arith.constant 0 : i32
    %c0_i32_1 = arith.constant 0 : i32
    %c0_i32_2 = arith.constant 0 : i32
    return %c0_i32, %c0_i32_0, %c0_i32_1 : i32, i32, i32
  }
}

</mosaic_0001>

<bundles_post_ra>
// kernel: tpu_custom_call.1
= control target key start
LH: loop header
LB: loop body
LE: loop exit
PB: predicated region body
PF: predicated region fallthrough
CT: control target
= control target key end

     0   :  { %8 = vsyncpa [#allocation3], 0  ;;  %s312_s0 = inlined_call_operand.hbm [shape: f32[16,128], index: 0, kind: input, shape index: {}]   ;;  %s313_s1 = inlined_call_operand.hbm [shape: f32[16,128], index: 1, kind: input, shape index: {}]   ;;  %s314_s2 = inlined_call_operand.hbm [shape: f32[16,128], index: 2, kind: input, shape index: {}]   ;;  %s315_s3 = inlined_call_operand.hbm [shape: f32[4,8,128], index: 3, kind: output, shape index: {}]  }
   0x1   :  { %9 = vsyncpa [#allocation6], 0 }
   0x2   :  { %10 = vsyncpa [#allocation4], 0  ;;  %s28_s14 = sshll.u32 %s313_s1, 4  ;;  %s262_s15 = smov [#allocation5]   ;;  %s29_s14 = int_to_ptr.hbm [resolvable:$true] %s28_s14 }
   0x3   :  { %s30_s16 = sshll.u32 %s262_s15, 4  ;;  %s15_s19 = sshll.u32 %s312_s0, 4  ;;  %s31_s16 = int_to_ptr.vmem [resolvable:$true] %s30_s16  ;;  %s16_s19 = int_to_ptr.hbm [resolvable:$true] %s15_s19 }
   0x4   :  { %s263_s20 = smov 128   ;;  %s264_s21 = smov 8  }
   0x5   :  { %36 = dma.hbm_to_vmem [thread:$0]  %s29_s14, 256, %s31_s16, [#allocation6], %s263_s20, %s263_s20, %s264_s21  }
   0x6   :  { %s265_s22 = smov [#allocation2]   ;;  %s41_s1 = sshll.u32 %s314_s2, 4  ;;  %s42_s1 = int_to_ptr.hbm [resolvable:$true] %s41_s1 }
   0x7   :  { %s17_s23 = sshll.u32 %s265_s22, 4  ;;  %s266_s0 = smov [#allocation7]   ;;  %s18_s23 = int_to_ptr.vmem [resolvable:$true] %s17_s23 }
   0x8   :  { %23 = dma.hbm_to_vmem [thread:$0]  %s16_s19, 256, %s18_s23, [#allocation3], %s263_s20, %s263_s20, %s264_s21  }
   0x9   :  { %s43_s26 = sshll.u32 %s266_s0, 4  ;;  %s44_s26 = int_to_ptr.vmem [resolvable:$true] %s43_s26 }
   0xa   :  { %49 = dma.hbm_to_vmem [thread:$0]  %s42_s1, 256, %s44_s26, [#allocation6], %s263_s20, %s263_s20, %s264_s21  }
   0xb   :  { %256 = dma.done.wait [#allocation3], 256  }
   0xc   :  { %257 = vsyncadd [#allocation3], 4294967040 }
   0xd   :  { %258 = dma.done.wait [#allocation6], 512  }
   0xe   :  { %259 = vsyncadd [#allocation6], 4294966784  ;;  %v70_v0 = vld [vmem:[#allocation2] sm:$0xff]  ;;  %v71_v1 = vld [vmem:[#allocation2 + $0x8] sm:$0xff]  ;;  %s267_s2 = smov [#allocation8]   ;;  %s131_s30 = sshll.u32 %s315_s3, 4  ;;  %s132_s30 = int_to_ptr.hbm [resolvable:$true] %s131_s30 }
   0xf   :  { %v72_v2 = vmax.f32 %v70_v0, 0.0001  ;;  %v73_v3 = vmax.f32 %v71_v1, 0.0001  ;;  %v76_v4 = vld [vmem:[#allocation5] sm:$0xff]  ;;  %v77_v5 = vld [vmem:[#allocation5 + $0x8] sm:$0xff] }
  0x10   :  { %v78_v6 = vld [vmem:[#allocation7] sm:$0xff]  ;;  %v79_v7 = vld [vmem:[#allocation7 + $0x8] sm:$0xff]  ;;  %v117_v8 = vadd.f32 %v77_v5, %v76_v4  ;;  %s129_s27 = sshll.u32 %s267_s2, 4  ;;  %s130_s27 = int_to_ptr.vmem [resolvable:$true] %s129_s27 }
  0x11   :  { %v74_v9 = vmin.f32 %v72_v2, 0.9999  ;;  %v75_v10 = vmin.f32 %v73_v3, 0.9999  ;;  %v122_v11 = vadd.f32 %v79_v7, %v78_v6 }
  0x12   :  { %119 = vst [vmem:[#allocation8 + $0x10] sm:$0xff] %v117_v8 }
  0x13   :  { %152 = vlog2.f32 %v74_v9  ;;  %v86_v12 = vsub.f32 1.0, %v74_v9  ;;  %v87_v13 = vsub.f32 1.0, %v75_v10  ;;  %124 = vst [vmem:[#allocation8 + $0x18] sm:$0xff] %v122_v11  ;;  %v100_v24 = vmul.f32 %v74_v9, %v74_v9 }
  0x14   :  { %154 = vlog2.f32 %v75_v10  ;;  %v101_v27 = vmul.f32 %v75_v10, %v75_v10 }
  0x15   :  { %156 = vlog2.f32 %v86_v12  ;;  %v88_v17 = vmul.f32 %v86_v12, %v86_v12  ;;  %v89_v20 = vmul.f32 %v87_v13, %v87_v13 }
  0x16   :  { %158 = vlog2.f32 %v87_v13 }
  0x19   :  { %v153_v14 = vpop.eup %152 }
  0x1a   :  { %v155_v15 = vpop.eup %154  ;;  %v81_v16 = vmul.f32 0.6931472, %v153_v14 }
  0x1b   :  { %v157_v18 = vpop.eup %156  ;;  %v83_v19 = vmul.f32 0.6931472, %v155_v15 }
  0x1c   :  { %v159_v21 = vpop.eup %158  ;;  %v84_v22 = vsub.f32 0.0, %v81_v16  ;;  %v95_v23 = vmul.f32 0.6931472, %v157_v18 }
  0x1d   :  { %v85_v25 = vsub.f32 0.0, %v83_v19  ;;  %v97_v26 = vmul.f32 0.6931472, %v159_v21 }
  0x1e   :  { %v90_v28 = vmul.f32 %v88_v17, %v84_v22  ;;  %v98_v29 = vsub.f32 0.0, %v95_v23 }
  0x1f   :  { %v91_v30 = vmul.f32 %v89_v20, %v85_v25  ;;  %v99_v31 = vsub.f32 0.0, %v97_v26 }
  0x20   :  { %v92_v32 = vmul.f32 %v90_v28, %v76_v4  ;;  %v102_v33 = vmul.f32 %v100_v24, %v98_v29 }
  0x21   :  { %v93_v34 = vmul.f32 %v91_v30, %v77_v5  ;;  %v103_v35 = vmul.f32 %v101_v27, %v99_v31 }
  0x22   :  { %v104_v36 = vmul.f32 %v102_v33, %v78_v6 }
  0x23   :  { %v107_v37 = vadd.f32 %v93_v34, %v92_v32  ;;  %v105_v38 = vmul.f32 %v103_v35, %v79_v7 }
  0x25   :  { %v112_v39 = vadd.f32 %v105_v38, %v104_v36  ;;  %109 = vst [vmem:[#allocation8] sm:$0xff] %v107_v37 }
  0x27   :  { %114 = vst [vmem:[#allocation8 + $0x8] sm:$0xff] %v112_v39 }
  0x28   :  { %137 = dma.vmem_to_hbm [thread:$0]  %s130_s27, 512, %s132_s30, [#allocation4], %s263_s20, %s263_s20, %s264_s21  }
  0x29   :  { %260 = dma.done.wait [#allocation4], 512  }
  0x2a   :  { %261 = vsyncadd [#allocation4], 4294966784 }
  0x2b   :  { %142 = vsyncpa [#allocation3], 1 }
  0x2c   :  { %143 = vsyncpa [#allocation6], 1 }
  0x2d   :  { %144 = vsyncpa [#allocation4], 1 }

</bundles_post_ra>
